<compile_context>
chip_gen: v7x
topology: tpu7x:2x2x1
jax: 0.10.0
libtpu: 0.0.40
codegen_flags: <defaults>
</compile_context>

<pallas_src>
import functools

import jax
import jax.numpy as jnp
from jax import lax
from jax.experimental import pallas as pl
from jax.experimental.pallas import tpu as pltpu

NUM_OPS = 10
LEFT_PAD = 8    # max left reach: causal dilated conv k=5, d=2 -> d*(k-1) = 8
RIGHT_PAD = 4   # max right reach: dilated conv k=5, d=2 -> d*(k-1)//2 = 4

# Unique tap start offsets into the padded length axis (padded idx = LEFT_PAD + i,
# start(t) = LEFT_PAD - pad_left + t * dilation).
STARTS = (0, 2, 4, 6, 7, 8, 9, 10, 12)
START_IDX = {s: i for i, s in enumerate(STARTS)}
N_TAPS = len(STARTS)

# (weight key, bias key, row, tap offsets) for the 6 conv ops, in alpha order 0..5.
CONV_TAPS = (
    ("w3", "b3", 0, (7, 8, 9)),            # Conv1D k=3, p=1, d=1
    ("w3", "b3", 1, (6, 8, 10)),           # DilConv1D k=3, d=2
    ("w3", "b3", 2, (4, 6, 8)),            # CausalDilConv1D k=3, d=2
    ("w5", "b5", 0, (6, 7, 8, 9, 10)),     # Conv1D k=5, p=2, d=1
    ("w5", "b5", 1, (4, 6, 8, 10, 12)),    # DilConv1D k=5, d=2
    ("w5", "b5", 2, (0, 2, 4, 6, 8)),      # CausalDilConv1D k=5, d=2
)


def _search_edge_kernel(Bt, L, alpha_ref, x_ref, w_ref, b_ref, o_ref,
                        xpad_ref, col_ref):
    """One grid step: Bt sequences of length L; channel dim already padded to Cp."""
    Cp = x_ref.shape[1]
    a6 = alpha_ref[6]                       # MaxPool mixing weight (only nonlinear op)

    # Pre-zero only the 12 halo rows of the padded scratch; the interior is
    # overwritten per batch below (no full-buffer copy / concatenate).
    xpad_ref[pl.ds(0, LEFT_PAD), :] = jnp.zeros((LEFT_PAD, Cp), jnp.bfloat16)
    xpad_ref[pl.ds(LEFT_PAD + L, RIGHT_PAD), :] = (
        jnp.zeros((RIGHT_PAD, Cp), jnp.bfloat16))

    for b in range(Bt):
        rows = pl.ds(b * L, L)
        # ReLU, then cast to bf16 once: all windowing / im2col traffic is bf16.
        xpad_ref[pl.ds(LEFT_PAD, L), :] = (
            jnp.maximum(x_ref[rows, :], 0.0).astype(jnp.bfloat16))

        # Load each of the 9 unique tap windows exactly once and store it
        # straight into its lane-aligned slice of the im2col scratch; the 3
        # pool windows are reused in-register for the max pool.
        pool = {}
        for t, s in enumerate(STARTS):
            win = xpad_ref[pl.ds(s, L), :]
            col_ref[rows, pl.ds(t * Cp, Cp)] = win
            if s in (7, 8, 9):
                pool[s] = win

        # MaxPool k=3, s=1, p=1.  Zero padding is a valid stand-in for -inf
        # ONLY because x is post-ReLU (all values >= 0).
        m = jnp.maximum(jnp.maximum(pool[7], pool[8]), pool[9])
        o_ref[rows, :] = (a6 * m.astype(jnp.float32)).astype(o_ref.dtype)

    # One fused MXU matmul covers the 6 convs + AvgPool + SkipConnect (alpha is
    # folded into w_ref / b_ref in the wrapper): bf16 x bf16 -> f32 accumulate.
    # NoneConnect contributes zero; alpha[9] is unused by construction.
    y = jnp.dot(col_ref[...], w_ref[...], preferred_element_type=jnp.float32)
    o_ref[...] = (y + b_ref[...] + o_ref[...].astype(jnp.float32)).astype(o_ref.dtype)


def _pack_weights(alpha, params, C, Cp):
    """Fold alpha (f32) into one packed (9*Cp, Cp) bf16 weight and a (1, Cp) f32 bias."""
    alpha = alpha.astype(jnp.float32)
    w_eff = jnp.zeros((N_TAPS, C, C), jnp.float32)
    b_eff = jnp.zeros((C,), jnp.float32)

    for op_i, (wk, bk, row, taps) in enumerate(CONV_TAPS):
        a = alpha[op_i]
        w = params[wk][row].astype(jnp.float32)                 # (K, C_in, C_out)
        b = params[bk][row].reshape(C).astype(jnp.float32)
        for t, s in enumerate(taps):
            w_eff = w_eff.at[START_IDX[s]].add(a * w[t])
        b_eff = b_eff + a * b

    # Linear ops folded into the same matmul:
    eye = jnp.eye(C, dtype=jnp.float32)
    for s in (7, 8, 9):                                         # AvgPool k=3, p=1
        w_eff = w_eff.at[START_IDX[s]].add((alpha[7] / 3.0) * eye)
    w_eff = w_eff.at[START_IDX[8]].add(alpha[8] * eye)          # SkipConnect
    # NoneConnect (alpha[9]) contributes zero.

    # Zero-pad channels to Cp (multiple of 128) so every im2col window, the
    # matmul N dimension and the output store are 128-lane aligned / dense.
    w_pad = jnp.zeros((N_TAPS, Cp, Cp), jnp.float32).at[:, :C, :C].set(w_eff)
    b_pad = jnp.zeros((1, Cp), jnp.float32).at[0, :C].set(b_eff)
    # Fold alpha in f32 first, cast to bf16 once (MXU-native input dtype).
    return w_pad.reshape(N_TAPS * Cp, Cp).astype(jnp.bfloat16), b_pad


def _default_batch_blocks(B, L):
    """v7x has 2 TensorCores (shard the parallel grid); v5e/v6e have one -> grid of 1."""
    try:
        kind = jax.devices()[0].device_kind.lower()
    except Exception:
        kind = ""
    if "v7" in kind and B % 2 == 0 and ((B // 2) * L) % 8 == 0:
        return 2
    return 1


def search_edge_forward(x_ncl, alpha, params, batch_blocks=None):
    """x_ncl: (B, C, L) like PyTorch nn.Conv1d input; alpha: (10,)."""
    B, C, L = x_ncl.shape
    Cp = ((C + 127) // 128) * 128
    if batch_blocks is None:
        batch_blocks = _default_batch_blocks(B, L)
    assert B % batch_blocks == 0
    Bt = B // batch_blocks
    assert batch_blocks == 1 or (Bt * L) % 8 == 0

    alpha = alpha.astype(jnp.float32)
    w_eff, b_eff = _pack_weights(alpha, params, C, Cp)

    # Layout change done ONCE in plain XLA (not per grid step on the XLU):
    # NCL -> NLC, zero-pad channels to Cp, flatten batch into the matmul M dim.
    x_nlc = jnp.transpose(x_ncl, (0, 2, 1))                     # (B, L, C)
    if Cp != C:
        x_nlc = jnp.pad(x_nlc, ((0, 0), (0, 0), (0, Cp - C)))
    x_flat = x_nlc.reshape(B * L, Cp)                           # lane-dense (..., Cp)

    kernel = functools.partial(_search_edge_kernel, Bt, L)
    Lp = LEFT_PAD + L + RIGHT_PAD

    out_flat = pl.pallas_call(
        kernel,
        out_shape=jax.ShapeDtypeStruct((B * L, Cp), x_ncl.dtype),
        grid=(batch_blocks,),
        in_specs=[
            pl.BlockSpec(memory_space=pltpu.MemorySpace.SMEM),  # alpha (10,)
            pl.BlockSpec((Bt * L, Cp), lambda b: (b, 0)),       # x, NLC flat
            pl.BlockSpec((N_TAPS * Cp, Cp), lambda b: (0, 0)),  # packed W (bf16)
            pl.BlockSpec((1, Cp), lambda b: (0, 0)),            # packed bias (f32)
        ],
        out_specs=pl.BlockSpec((Bt * L, Cp), lambda b: (b, 0)),
        scratch_shapes=[
            pltpu.VMEM((Lp, Cp), jnp.bfloat16),                 # zero-padded x tile
            pltpu.VMEM((Bt * L, N_TAPS * Cp), jnp.bfloat16),    # im2col scratch
        ],
        compiler_params=pltpu.CompilerParams(
            dimension_semantics=("parallel",)),
    )(alpha, x_flat, w_eff, b_eff)

    out = out_flat.reshape(B, L, Cp)[:, :, :C]
    return jnp.transpose(out, (0, 2, 1))                        # back to NCL


def reference_forward(x_ncl, alpha, params):
    """Plain-JAX reference (lax convs / reduce_window) for validation."""
    x = jax.nn.relu(x_ncl)
    C = x.shape[1]
    dn = ("NCH", "OIH", "NCH")

    def conv(w_kio, b, pad, dil):
        w = jnp.transpose(w_kio, (2, 1, 0))                     # (Cout, Cin, K)
        y = lax.conv_general_dilated(x, w, (1,), [pad], rhs_dilation=(dil,),
                                     dimension_numbers=dn)
        return y + b.reshape(1, C, 1)

    ops = [
        conv(params["w3"][0], params["b3"][0], (1, 1), 1),
        conv(params["w3"][1], params["b3"][1], (2, 2), 2),
        conv(params["w3"][2], params["b3"][2], (4, 0), 2),
        conv(params["w5"][0], params["b5"][0], (2, 2), 1),
        conv(params["w5"][1], params["b5"][1], (4, 4), 2),
        conv(params["w5"][2], params["b5"][2], (8, 0), 2),
        lax.reduce_window(x, -jnp.inf, lax.max, (1, 1, 3), (1, 1, 1),
                          [(0, 0), (0, 0), (1, 1)]),
        lax.reduce_window(x, 0.0, lax.add, (1, 1, 3), (1, 1, 1),
                          [(0, 0), (0, 0), (1, 1)]) / 3.0,
        x,
        jnp.zeros_like(x),
    ]
    h = jnp.stack(ops)                                          # (10, B, C, L)
    return jnp.sum(h * alpha.reshape(-1, 1, 1, 1), axis=0)


if __name__ == "__main__":
    B, C, L = 2, 32, 16          # batch, num_hidden channels, sequence length

    key = jax.random.PRNGKey(0)
    k1, k2, k3, k4, k5, k6 = jax.random.split(key, 6)

    params = {
        # conv weights stored as (op, tap, C_in, C_out)
        "w3": jax.random.normal(k1, (3, 3, C, C), jnp.float32) / jnp.sqrt(3.0 * C),
        "b3": jax.random.normal(k2, (3, 1, C), jnp.float32) * 0.1,
        "w5": jax.random.normal(k3, (3, 5, C, C), jnp.float32) / jnp.sqrt(5.0 * C),
        "b5": jax.random.normal(k4, (3, 1, C), jnp.float32) * 0.1,
    }

    x = jax.random.normal(k5, (B, C, L), jnp.float32)
    alpha = jax.nn.softmax(jax.random.normal(k6, (NUM_OPS,), jnp.float32))

    # Keep the alpha-folding (weight packing) inside the same jit as the call
    # so it is not re-dispatched eagerly every step.
    fwd = jax.jit(lambda xx, aa: search_edge_forward(xx, aa, params))

    out = jax.block_until_ready(fwd(x, alpha))
    ref = jax.block_until_ready(reference_forward(x, alpha, params))

    assert out.shape == (B, C, L), out.shape
    # bf16 MXU inputs with f32 accumulation -> loosened tolerance vs. f32 ref.
    # (SkipConnect / AvgPool are routed through the bf16 matmul, so the skip
    #  path is not an exact f32 pass-through.)
    max_err = float(jnp.max(jnp.abs(out - ref)))
    assert max_err < 2e-2, f"mismatch vs reference: {max_err}"

    print("KERNEL_OK")
</pallas_src>

<mosaic_0001>
module attributes {stable_mosaic.version = 11 : i64} {
  func.func @_search_edge_kernel(%arg0: i32, %arg1: memref<10xf32, #tpu.memory_space<smem>>, %arg2: memref<32x128xf32, #tpu.memory_space<vmem>>, %arg3: memref<1152x128xbf16, #tpu.memory_space<vmem>>, %arg4: memref<1x128xf32, #tpu.memory_space<vmem>>, %arg5: memref<32x128xf32, #tpu.memory_space<vmem>>, %arg6: memref<28x128xbf16, #tpu.memory_space<vmem>>, %arg7: memref<32x1152xbf16, #tpu.memory_space<vmem>>) attributes {dimension_semantics = [#tpu.dimension_semantics<parallel>], iteration_bounds = array<i64: 1>, scalar_prefetch = 0 : i64, scratch_operands = 2 : i64, tpu.core_type = #tpu.core_type<tc>, window_params = [{transform_indices = @transform_0, window_bounds = array<i64: 10>}, {transform_indices = @transform_1, window_bounds = array<i64: 32, 128>}, {pipeline_mode = #tpu.pipeline_mode<synchronous>, transform_indices = @transform_2, window_bounds = array<i64: 1152, 128>}, {pipeline_mode = #tpu.pipeline_mode<synchronous>, transform_indices = @transform_3, window_bounds = array<i64: 1, 128>}, {transform_indices = @transform_4, window_bounds = array<i64: 32, 128>}]} {
    %c6 = arith.constant 6 : index
    %0 = memref.load %arg1[%c6] : memref<10xf32, #tpu.memory_space<smem>>
    %cst = arith.constant 0.000000e+00 : bf16
    %1 = vector.broadcast %cst : bf16 to vector<8x128xbf16>
    %c0 = arith.constant 0 : index
    %c0_0 = arith.constant 0 : index
    %2 = vector.load %arg6[%c0, %c0_0] : memref<28x128xbf16, #tpu.memory_space<vmem>>, vector<8x128xbf16>
    tpu.vector_store %arg6[%c0, %c0_0], %1 {strides = array<i32>} : memref<28x128xbf16, #tpu.memory_space<vmem>>, vector<8x128xbf16>,
    %cst_1 = arith.constant 0.000000e+00 : bf16
    %3 = vector.broadcast %cst_1 : bf16 to vector<4x128xbf16>
    %c24 = arith.constant 24 : index
    %c0_2 = arith.constant 0 : index
    %4 = vector.load %arg6[%c24, %c0_2] : memref<28x128xbf16, #tpu.memory_space<vmem>>, vector<4x128xbf16>
    tpu.vector_store %arg6[%c24, %c0_2], %3 {strides = array<i32>} : memref<28x128xbf16, #tpu.memory_space<vmem>>, vector<4x128xbf16>,
    %c0_3 = arith.constant 0 : index
    %c0_4 = arith.constant 0 : index
    %5 = vector.load %arg2[%c0_3, %c0_4] : memref<32x128xf32, #tpu.memory_space<vmem>>, vector<16x128xf32>
    %cst_5 = arith.constant 0.000000e+00 : f32
    %6 = vector.broadcast %cst_5 : f32 to vector<16x128xf32>
    %7 = arith.maximumf %5, %6 : vector<16x128xf32>
    %8 = arith.truncf %7 : vector<16x128xf32> to vector<16x128xbf16>
    %c8 = arith.constant 8 : index
    %c0_6 = arith.constant 0 : index
    %9 = vector.load %arg6[%c8, %c0_6] : memref<28x128xbf16, #tpu.memory_space<vmem>>, vector<16x128xbf16>
    tpu.vector_store %arg6[%c8, %c0_6], %8 {strides = array<i32>} : memref<28x128xbf16, #tpu.memory_space<vmem>>, vector<16x128xbf16>,
    %c0_7 = arith.constant 0 : index
    %c0_8 = arith.constant 0 : index
    %10 = vector.load %arg6[%c0_7, %c0_8] : memref<28x128xbf16, #tpu.memory_space<vmem>>, vector<16x128xbf16>
    %c0_9 = arith.constant 0 : index
    %c0_10 = arith.constant 0 : index
    %11 = vector.load %arg7[%c0_9, %c0_10] : memref<32x1152xbf16, #tpu.memory_space<vmem>>, vector<16x128xbf16>
    tpu.vector_store %arg7[%c0_9, %c0_10], %10 {strides = array<i32>} : memref<32x1152xbf16, #tpu.memory_space<vmem>>, vector<16x128xbf16>,
    %c2 = arith.constant 2 : index
    %c0_11 = arith.constant 0 : index
    %12 = vector.load %arg6[%c2, %c0_11] : memref<28x128xbf16, #tpu.memory_space<vmem>>, vector<16x128xbf16>
    %c0_12 = arith.constant 0 : index
    %c128 = arith.constant 128 : index
    %13 = vector.load %arg7[%c0_12, %c128] : memref<32x1152xbf16, #tpu.memory_space<vmem>>, vector<16x128xbf16>
    tpu.vector_store %arg7[%c0_12, %c128], %12 {strides = array<i32>} : memref<32x1152xbf16, #tpu.memory_space<vmem>>, vector<16x128xbf16>,
    %c4 = arith.constant 4 : index
    %c0_13 = arith.constant 0 : index
    %14 = vector.load %arg6[%c4, %c0_13] : memref<28x128xbf16, #tpu.memory_space<vmem>>, vector<16x128xbf16>
    %c0_14 = arith.constant 0 : index
    %c256 = arith.constant 256 : index
    %15 = vector.load %arg7[%c0_14, %c256] : memref<32x1152xbf16, #tpu.memory_space<vmem>>, vector<16x128xbf16>
    tpu.vector_store %arg7[%c0_14, %c256], %14 {strides = array<i32>} : memref<32x1152xbf16, #tpu.memory_space<vmem>>, vector<16x128xbf16>,
    %c6_15 = arith.constant 6 : index
    %c0_16 = arith.constant 0 : index
    %16 = vector.load %arg6[%c6_15, %c0_16] : memref<28x128xbf16, #tpu.memory_space<vmem>>, vector<16x128xbf16>
    %c0_17 = arith.constant 0 : index
    %c384 = arith.constant 384 : index
    %17 = vector.load %arg7[%c0_17, %c384] : memref<32x1152xbf16, #tpu.memory_space<vmem>>, vector<16x128xbf16>
    tpu.vector_store %arg7[%c0_17, %c384], %16 {strides = array<i32>} : memref<32x1152xbf16, #tpu.memory_space<vmem>>, vector<16x128xbf16>,
    %c7 = arith.constant 7 : index
    %c0_18 = arith.constant 0 : index
    %18 = vector.load %arg6[%c7, %c0_18] : memref<28x128xbf16, #tpu.memory_space<vmem>>, vector<16x128xbf16>
    %c0_19 = arith.constant 0 : index
    %c512 = arith.constant 512 : index
    %19 = vector.load %arg7[%c0_19, %c512] : memref<32x1152xbf16, #tpu.memory_space<vmem>>, vector<16x128xbf16>
    tpu.vector_store %arg7[%c0_19, %c512], %18 {strides = array<i32>} : memref<32x1152xbf16, #tpu.memory_space<vmem>>, vector<16x128xbf16>,
    %c8_20 = arith.constant 8 : index
    %c0_21 = arith.constant 0 : index
    %20 = vector.load %arg6[%c8_20, %c0_21] : memref<28x128xbf16, #tpu.memory_space<vmem>>, vector<16x128xbf16>
    %c0_22 = arith.constant 0 : index
    %c640 = arith.constant 640 : index
    %21 = vector.load %arg7[%c0_22, %c640] : memref<32x1152xbf16, #tpu.memory_space<vmem>>, vector<16x128xbf16>
    tpu.vector_store %arg7[%c0_22, %c640], %20 {strides = array<i32>} : memref<32x1152xbf16, #tpu.memory_space<vmem>>, vector<16x128xbf16>,
    %c9 = arith.constant 9 : index
    %c0_23 = arith.constant 0 : index
    %22 = vector.load %arg6[%c9, %c0_23] : memref<28x128xbf16, #tpu.memory_space<vmem>>, vector<16x128xbf16>
    %c0_24 = arith.constant 0 : index
    %c768 = arith.constant 768 : index
    %23 = vector.load %arg7[%c0_24, %c768] : memref<32x1152xbf16, #tpu.memory_space<vmem>>, vector<16x128xbf16>
    tpu.vector_store %arg7[%c0_24, %c768], %22 {strides = array<i32>} : memref<32x1152xbf16, #tpu.memory_space<vmem>>, vector<16x128xbf16>,
    %c10 = arith.constant 10 : index
    %c0_25 = arith.constant 0 : index
    %24 = vector.load %arg6[%c10, %c0_25] : memref<28x128xbf16, #tpu.memory_space<vmem>>, vector<16x128xbf16>
    %c0_26 = arith.constant 0 : index
    %c896 = arith.constant 896 : index
    %25 = vector.load %arg7[%c0_26, %c896] : memref<32x1152xbf16, #tpu.memory_space<vmem>>, vector<16x128xbf16>
    tpu.vector_store %arg7[%c0_26, %c896], %24 {strides = array<i32>} : memref<32x1152xbf16, #tpu.memory_space<vmem>>, vector<16x128xbf16>,
    %c12 = arith.constant 12 : index
    %c0_27 = arith.constant 0 : index
    %26 = vector.load %arg6[%c12, %c0_27] : memref<28x128xbf16, #tpu.memory_space<vmem>>, vector<16x128xbf16>
    %c0_28 = arith.constant 0 : index
    %c1024 = arith.constant 1024 : index
    %27 = vector.load %arg7[%c0_28, %c1024] : memref<32x1152xbf16, #tpu.memory_space<vmem>>, vector<16x128xbf16>
    tpu.vector_store %arg7[%c0_28, %c1024], %26 {strides = array<i32>} : memref<32x1152xbf16, #tpu.memory_space<vmem>>, vector<16x128xbf16>,
    %28 = arith.maximumf %18, %20 : vector<16x128xbf16>
    %29 = arith.maximumf %28, %22 : vector<16x128xbf16>
    %30 = arith.extf %29 : vector<16x128xbf16> to vector<16x128xf32>
    %31 = vector.broadcast %0 : f32 to vector<16x128xf32>
    %32 = arith.mulf %31, %30 : vector<16x128xf32>
    %c0_29 = arith.constant 0 : index
    %c0_30 = arith.constant 0 : index
    %33 = vector.load %arg5[%c0_29, %c0_30] : memref<32x128xf32, #tpu.memory_space<vmem>>, vector<16x128xf32>
    tpu.vector_store %arg5[%c0_29, %c0_30], %32 {strides = array<i32>} : memref<32x128xf32, #tpu.memory_space<vmem>>, vector<16x128xf32>,
    %c16 = arith.constant 16 : index
    %c0_31 = arith.constant 0 : index
    %34 = vector.load %arg2[%c16, %c0_31] : memref<32x128xf32, #tpu.memory_space<vmem>>, vector<16x128xf32>
    %cst_32 = arith.constant 0.000000e+00 : f32
    %35 = vector.broadcast %cst_32 : f32 to vector<16x128xf32>
    %36 = arith.maximumf %34, %35 : vector<16x128xf32>
    %37 = arith.truncf %36 : vector<16x128xf32> to vector<16x128xbf16>
    %c8_33 = arith.constant 8 : index
    %c0_34 = arith.constant 0 : index
    %38 = vector.load %arg6[%c8_33, %c0_34] : memref<28x128xbf16, #tpu.memory_space<vmem>>, vector<16x128xbf16>
    tpu.vector_store %arg6[%c8_33, %c0_34], %37 {strides = array<i32>} : memref<28x128xbf16, #tpu.memory_space<vmem>>, vector<16x128xbf16>,
    %c0_35 = arith.constant 0 : index
    %c0_36 = arith.constant 0 : index
    %39 = vector.load %arg6[%c0_35, %c0_36] : memref<28x128xbf16, #tpu.memory_space<vmem>>, vector<16x128xbf16>
    %c16_37 = arith.constant 16 : index
    %c0_38 = arith.constant 0 : index
    %40 = vector.load %arg7[%c16_37, %c0_38] : memref<32x1152xbf16, #tpu.memory_space<vmem>>, vector<16x128xbf16>
    tpu.vector_store %arg7[%c16_37, %c0_38], %39 {strides = array<i32>} : memref<32x1152xbf16, #tpu.memory_space<vmem>>, vector<16x128xbf16>,
    %c2_39 = arith.constant 2 : index
    %c0_40 = arith.constant 0 : index
    %41 = vector.load %arg6[%c2_39, %c0_40] : memref<28x128xbf16, #tpu.memory_space<vmem>>, vector<16x128xbf16>
    %c16_41 = arith.constant 16 : index
    %c128_42 = arith.constant 128 : index
    %42 = vector.load %arg7[%c16_41, %c128_42] : memref<32x1152xbf16, #tpu.memory_space<vmem>>, vector<16x128xbf16>
    tpu.vector_store %arg7[%c16_41, %c128_42], %41 {strides = array<i32>} : memref<32x1152xbf16, #tpu.memory_space<vmem>>, vector<16x128xbf16>,
    %c4_43 = arith.constant 4 : index
    %c0_44 = arith.constant 0 : index
    %43 = vector.load %arg6[%c4_43, %c0_44] : memref<28x128xbf16, #tpu.memory_space<vmem>>, vector<16x128xbf16>
    %c16_45 = arith.constant 16 : index
    %c256_46 = arith.constant 256 : index
    %44 = vector.load %arg7[%c16_45, %c256_46] : memref<32x1152xbf16, #tpu.memory_space<vmem>>, vector<16x128xbf16>
    tpu.vector_store %arg7[%c16_45, %c256_46], %43 {strides = array<i32>} : memref<32x1152xbf16, #tpu.memory_space<vmem>>, vector<16x128xbf16>,
    %c6_47 = arith.constant 6 : index
    %c0_48 = arith.constant 0 : index
    %45 = vector.load %arg6[%c6_47, %c0_48] : memref<28x128xbf16, #tpu.memory_space<vmem>>, vector<16x128xbf16>
    %c16_49 = arith.constant 16 : index
    %c384_50 = arith.constant 384 : index
    %46 = vector.load %arg7[%c16_49, %c384_50] : memref<32x1152xbf16, #tpu.memory_space<vmem>>, vector<16x128xbf16>
    tpu.vector_store %arg7[%c16_49, %c384_50], %45 {strides = array<i32>} : memref<32x1152xbf16, #tpu.memory_space<vmem>>, vector<16x128xbf16>,
    %c7_51 = arith.constant 7 : index
    %c0_52 = arith.constant 0 : index
    %47 = vector.load %arg6[%c7_51, %c0_52] : memref<28x128xbf16, #tpu.memory_space<vmem>>, vector<16x128xbf16>
    %c16_53 = arith.constant 16 : index
    %c512_54 = arith.constant 512 : index
    %48 = vector.load %arg7[%c16_53, %c512_54] : memref<32x1152xbf16, #tpu.memory_space<vmem>>, vector<16x128xbf16>
    tpu.vector_store %arg7[%c16_53, %c512_54], %47 {strides = array<i32>} : memref<32x1152xbf16, #tpu.memory_space<vmem>>, vector<16x128xbf16>,
    %c8_55 = arith.constant 8 : index
    %c0_56 = arith.constant 0 : index
    %49 = vector.load %arg6[%c8_55, %c0_56] : memref<28x128xbf16, #tpu.memory_space<vmem>>, vector<16x128xbf16>
    %c16_57 = arith.constant 16 : index
    %c640_58 = arith.constant 640 : index
    %50 = vector.load %arg7[%c16_57, %c640_58] : memref<32x1152xbf16, #tpu.memory_space<vmem>>, vector<16x128xbf16>
    tpu.vector_store %arg7[%c16_57, %c640_58], %49 {strides = array<i32>} : memref<32x1152xbf16, #tpu.memory_space<vmem>>, vector<16x128xbf16>,
    %c9_59 = arith.constant 9 : index
    %c0_60 = arith.constant 0 : index
    %51 = vector.load %arg6[%c9_59, %c0_60] : memref<28x128xbf16, #tpu.memory_space<vmem>>, vector<16x128xbf16>
    %c16_61 = arith.constant 16 : index
    %c768_62 = arith.constant 768 : index
    %52 = vector.load %arg7[%c16_61, %c768_62] : memref<32x1152xbf16, #tpu.memory_space<vmem>>, vector<16x128xbf16>
    tpu.vector_store %arg7[%c16_61, %c768_62], %51 {strides = array<i32>} : memref<32x1152xbf16, #tpu.memory_space<vmem>>, vector<16x128xbf16>,
    %c10_63 = arith.constant 10 : index
    %c0_64 = arith.constant 0 : index
    %53 = vector.load %arg6[%c10_63, %c0_64] : memref<28x128xbf16, #tpu.memory_space<vmem>>, vector<16x128xbf16>
    %c16_65 = arith.constant 16 : index
    %c896_66 = arith.constant 896 : index
    %54 = vector.load %arg7[%c16_65, %c896_66] : memref<32x1152xbf16, #tpu.memory_space<vmem>>, vector<16x128xbf16>
    tpu.vector_store %arg7[%c16_65, %c896_66], %53 {strides = array<i32>} : memref<32x1152xbf16, #tpu.memory_space<vmem>>, vector<16x128xbf16>,
    %c12_67 = arith.constant 12 : index
    %c0_68 = arith.constant 0 : index
    %55 = vector.load %arg6[%c12_67, %c0_68] : memref<28x128xbf16, #tpu.memory_space<vmem>>, vector<16x128xbf16>
    %c16_69 = arith.constant 16 : index
    %c1024_70 = arith.constant 1024 : index
    %56 = vector.load %arg7[%c16_69, %c1024_70] : memref<32x1152xbf16, #tpu.memory_space<vmem>>, vector<16x128xbf16>
    tpu.vector_store %arg7[%c16_69, %c1024_70], %55 {strides = array<i32>} : memref<32x1152xbf16, #tpu.memory_space<vmem>>, vector<16x128xbf16>,
    %57 = arith.maximumf %47, %49 : vector<16x128xbf16>
    %58 = arith.maximumf %57, %51 : vector<16x128xbf16>
    %59 = arith.extf %58 : vector<16x128xbf16> to vector<16x128xf32>
    %60 = vector.broadcast %0 : f32 to vector<16x128xf32>
    %61 = arith.mulf %60, %59 : vector<16x128xf32>
    %c16_71 = arith.constant 16 : index
    %c0_72 = arith.constant 0 : index
    %62 = vector.load %arg5[%c16_71, %c0_72] : memref<32x128xf32, #tpu.memory_space<vmem>>, vector<16x128xf32>
    tpu.vector_store %arg5[%c16_71, %c0_72], %61 {strides = array<i32>} : memref<32x128xf32, #tpu.memory_space<vmem>>, vector<16x128xf32>,
    %c0_73 = arith.constant 0 : index
    %c0_74 = arith.constant 0 : index
    %63 = vector.load %arg7[%c0_73, %c0_74] : memref<32x1152xbf16, #tpu.memory_space<vmem>>, vector<32x1152xbf16>
    %c0_75 = arith.constant 0 : index
    %c0_76 = arith.constant 0 : index
    %64 = vector.load %arg3[%c0_75, %c0_76] : memref<1152x128xbf16, #tpu.memory_space<vmem>>, vector<1152x128xbf16>
    %cst_77 = arith.constant dense<0.000000e+00> : vector<32x128xf32>
    %65 = tpu.matmul %63, %64, %cst_77 {dimension_numbers = #tpu.dot_dimension_numbers<[1], [0], [0], [1], [0, 0, 1, 1], [], []>} : vector<32x1152xbf16>, vector<1152x128xbf16>, vector<32x128xf32> -> vector<32x128xf32>
    %c0_78 = arith.constant 0 : index
    %c0_79 = arith.constant 0 : index
    %66 = vector.load %arg4[%c0_78, %c0_79] : memref<1x128xf32, #tpu.memory_space<vmem>>, vector<1x128xf32>
    %67 = vector.broadcast %66 : vector<1x128xf32> to vector<32x128xf32>
    %68 = arith.addf %65, %67 : vector<32x128xf32>
    %c0_80 = arith.constant 0 : index
    %c0_81 = arith.constant 0 : index
    %69 = vector.load %arg5[%c0_80, %c0_81] : memref<32x128xf32, #tpu.memory_space<vmem>>, vector<32x128xf32>
    %70 = arith.addf %68, %69 : vector<32x128xf32>
    %c0_82 = arith.constant 0 : index
    %c0_83 = arith.constant 0 : index
    %71 = vector.load %arg5[%c0_82, %c0_83] : memref<32x128xf32, #tpu.memory_space<vmem>>, vector<32x128xf32>
    tpu.vector_store %arg5[%c0_82, %c0_83], %70 {strides = array<i32>} : memref<32x128xf32, #tpu.memory_space<vmem>>, vector<32x128xf32>,
    return
  }
  func.func @transform_0(%arg0: i32) -> i32 {
    %c0_i32 = arith.constant 0 : i32
    %c0_i32_0 = arith.constant 0 : i32
    return %c0_i32 : i32
  }
  func.func @transform_1(%arg0: i32) -> (i32, i32) {
    %c0_i32 = arith.constant 0 : i32
    %c0_i32_0 = arith.constant 0 : i32
    return %arg0, %c0_i32 : i32, i32
  }
  func.func @transform_2(%arg0: i32) -> (i32, i32) {
    %c0_i32 = arith.constant 0 : i32
    %c0_i32_0 = arith.constant 0 : i32
    %c0_i32_1 = arith.constant 0 : i32
    return %c0_i32, %c0_i32_0 : i32, i32
  }
  func.func @transform_3(%arg0: i32) -> (i32, i32) {
    %c0_i32 = arith.constant 0 : i32
    %c0_i32_0 = arith.constant 0 : i32
    %c0_i32_1 = arith.constant 0 : i32
    return %c0_i32, %c0_i32_0 : i32, i32
  }
  func.func @transform_4(%arg0: i32) -> (i32, i32) {
    %c0_i32 = arith.constant 0 : i32
    %c0_i32_0 = arith.constant 0 : i32
    return %arg0, %c0_i32 : i32, i32
  }
}

</mosaic_0001>

<bundles_post_ra>
// kernel: _lambda_.1
= control target key start
LH: loop header
LB: loop body
LE: loop exit
PB: predicated region body
PF: predicated region fallthrough
CT: control target
= control target key end

     0   :  { %9 = vsyncpa [#allocation5], 0  ;;  %s2125_s0 = inlined_call_operand.vmem [shape: f32[10], index: 0, kind: input, shape index: {}]   ;;  %s2126_s1 = inlined_call_operand.vmem [shape: f32[32,128], index: 1, kind: input, shape index: {}]   ;;  %s2127_s2 = inlined_call_operand.vmem [shape: bf16[1152,128], index: 2, kind: input, shape index: {}]   ;;  %s2128_s3 = inlined_call_operand.vmem [shape: f32[1,128], index: 3, kind: input, shape index: {}]   ;;  %s2129_s4 = inlined_call_operand.vmem [shape: f32[32,128], index: 4, kind: output, shape index: {}]  }
   0x1   :  { %s16_s17 = sshll.u32 %s2125_s0, 4  ;;  %s17_s17 = int_to_ptr.vmem [resolvable:$true] %s16_s17 }
   0x2   :  { %s1693_s18 = scalar_lea.vmem %s17_s17, 16  ;;  %p1698_p1 = scmp.lt.s32.totalorder %s17_s17, %s17_s17 }
   0x3   :  { %p1694_p0 = scmp.ne.s32.totalorder %s17_s17, %s1693_s18  ;;  %p1699_p2 = scmp.lt.s32.totalorder %s1693_s18, %s1693_s18 }
   0x5   :  { %p1700_p3 = por %p1699_p2, %p1698_p1 }
   0x7   :  { %p1701_p4 = pnand %p1700_p3, %p1694_p0 }
   0x9   :  { %1704 = shalt.err (!%p1701_p4)
}
   0xa   :  { %s1707_s19 = smov [#allocation4]  }
   0xb   :  { %19 = dma.vmem_to_smem %s17_s17, 16, %s1707_s19, [#allocation5]  }
   0xc   :  { %1705 = dma.done.wait [#allocation5], 16  }
   0xd   :  { %1706 = vsyncadd [#allocation5], 4294967280 }
   0xe   :  { %29 = sfence }
   0xf   :  { %v1595_v0 = vld [vmem:[%s2127_s2 + $0x40] sm:$0xff]   ;;  %v1708_v2 = vmov 0   ;;  %v1599_v5 = vld [vmem:[%s2127_s2 + $0x48] sm:$0xff]   ;;  %v1603_v9 = vld [vmem:[%s2127_s2 + $0x50] sm:$0xff]   ;;  %vm68_vm0 = vcmask 1046528   ;;  %vm102_vm1 = vcmask 1044480  }
  0x10   :  { %v1596_v1 = vld [vmem:[%s2127_s2] sm:$0xff]   ;;  %32 = vst [vmem:[#allocation2] sm:$0xf] %v1708_v2  ;;  %33 = vst [vmem:[#allocation2 + $0xc] sm:$0x3] %v1708_v2  ;;  %1451 = vmatprep.subr.bf16.mxu0 %v1595_v0  ;;  %v1600_v6 = vld [vmem:[%s2127_s2 + $0x8] sm:$0xff]  }
  0x11   :  { %v1597_v3 = vld [vmem:[%s2127_s2 + $0xc0] sm:$0xff]   ;;  %1452 = vmatpush3.bf16.msra.mxu0 %v1596_v1  ;;  %v1601_v7 = vld [vmem:[%s2127_s2 + $0xc8] sm:$0xff]   ;;  %v1604_v10 = vld [vmem:[%s2127_s2 + $0x10] sm:$0xff]   ;;  %vm85_vm2 = vcmask 1045504   ;;  %vm119_vm3 = vsmask.f32 4352 }
  0x12   :  { %v1598_v4 = vld [vmem:[%s2127_s2 + $0x80] sm:$0xff]   ;;  %1479 = vmatprep.subr.bf16.mxu1 %v1597_v3  ;;  %1453 = vmatprep.subr.bf16.mxu0 %v1599_v5  ;;  %v1602_v8 = vld [vmem:[%s2127_s2 + $0x88] sm:$0xff]   ;;  %v1605_v11 = vld [vmem:[%s2127_s2 + $0xd0] sm:$0xff]   ;;  %vm159_vm4 = vsmask.f32 7424  ;;  %vm234_vm7 = vcmask 1042432  }
  0x13   :  { %1480 = vmatpush3.bf16.msra.mxu1 %v1598_v4  ;;  %v1606_v12 = vld [vmem:[%s2127_s2 + $0x90] sm:$0xff]   ;;  %v1607_v13 = vld [vmem:[%s2127_s2 + $0x58] sm:$0xff]   ;;  %v1611_v17 = vld [vmem:[%s2127_s2 + $0x60] sm:$0xff]   ;;  %vm206_vm5 = vsmask.f32 3328  ;;  %vm235_vm9 = vcmask 1046532  }
  0x14   :  { %1481 = vmatprep.subr.bf16.mxu1 %v1601_v7  ;;  %v1608_v14 = vld [vmem:[%s2127_s2 + $0x18] sm:$0xff]   ;;  %v1612_v18 = vld [vmem:[%s2127_s2 + $0x20] sm:$0xff]   ;;  %v1615_v21 = vld [vmem:[%s2127_s2 + $0x68] sm:$0xff]   ;;  %vm207_vm6 = vsmask.f32 7440  ;;  %s1337_s7 = sld [smem:[#allocation4 + $0x6]] }
  0x15   :  { %1454 = vmatpush3.bf16.msra.mxu0 %v1600_v6  ;;  %v1609_v15 = vld [vmem:[%s2127_s2 + $0xd8] sm:$0xff]   ;;  %v1613_v19 = vld [vmem:[%s2127_s2 + $0xe0] sm:$0xff]   ;;  %v1616_v22 = vld [vmem:[%s2127_s2 + $0x28] sm:$0xff]  }
  0x16   :  { %1455 = vmatprep.subr.bf16.mxu0 %v1603_v9  ;;  %v1610_v16 = vld [vmem:[%s2127_s2 + $0x98] sm:$0xff]   ;;  %v1614_v20 = vld [vmem:[%s2127_s2 + $0xa0] sm:$0xff]   ;;  %v1617_v23 = vld [vmem:[%s2127_s2 + $0xe8] sm:$0xff]  }
  0x17   :  { %1482 = vmatpush3.bf16.msra.mxu1 %v1602_v8  ;;  %v1618_v24 = vld [vmem:[%s2127_s2 + $0xa8] sm:$0xff]   ;;  %v1619_v25 = vld [vmem:[%s2127_s2 + $0x70] sm:$0xff]   ;;  %v1623_v29 = vld [vmem:[%s2127_s2 + $0x78] sm:$0xff]  }
  0x18   :  { %1483 = vmatprep.subr.bf16.mxu1 %v1605_v11  ;;  %v1620_v26 = vld [vmem:[%s2127_s2 + $0x30] sm:$0xff]   ;;  %v1624_v30 = vld [vmem:[%s2127_s2 + $0x38] sm:$0xff]   ;;  %v34_v32 = vld [vmem:[%s2126_s1] sm:$0xff] }
  0x19   :  { %1456 = vmatpush3.bf16.msra.mxu0 %v1604_v10  ;;  %v1621_v27 = vld [vmem:[%s2127_s2 + $0xf0] sm:$0xff]   ;;  %v1625_v31 = vld [vmem:[%s2127_s2 + $0xf8] sm:$0xff]   ;;  %v35_v33 = vld [vmem:[%s2126_s1 + $0x8] sm:$0xff]  ;;  %v36_v34 = vmax.f32 %v34_v32, 0.0 }
  0x1a   :  { %1457 = vmatprep.subr.bf16.mxu0 %v1607_v13  ;;  %v1622_v28 = vld [vmem:[%s2127_s2 + $0xb0] sm:$0xff]   ;;  %v37_v35 = vmax.f32 %v35_v33, 0.0  ;;  %v1628_v36 = vld [vmem:[%s2127_s2 + $0xb8] sm:$0xff]   ;;  %v1630_v39 = vld [vmem:[%s2127_s2 + $0x140] sm:$0xff]  }
  0x1b   :  { %1484 = vmatpush3.bf16.msra.mxu1 %v1606_v12  ;;  %v1447_v37 = vpack.c.bf16 %v36_v34, %v36_v34  ;;  %v1636_v40 = vld [vmem:[%s2127_s2 + $0x1c0] sm:$0xff]   ;;  %v260_v41 = vld [vmem:[%s2126_s1 + $0x10] sm:$0xff]  ;;  %v261_v42 = vld [vmem:[%s2126_s1 + $0x18] sm:$0xff] }
  0x1c   :  { %1485 = vmatprep.subr.bf16.mxu1 %v1609_v15  ;;  %v1448_v38 = vpack.c.bf16 %v37_v35, %v37_v35  ;;  %v262_v43 = vmax.f32 %v260_v41, 0.0  ;;  %v263_v46 = vmax.f32 %v261_v42, 0.0  ;;  %v1633_v49 = vld [vmem:[%s2127_s2 + $0x100] sm:$0xff]   ;;  %v1638_v59 = vld [vmem:[%s2127_s2 + $0x148] sm:$0xff]   ;;  %v1642_v7 = vld [vmem:[%s2127_s2 + $0x150] sm:$0xff]  }
  0x1d   :  { %1458 = vmatpush3.bf16.msra.mxu0 %v1608_v14  ;;  %46 = vst [vmem:[#allocation2 + $0x4] sm:$0xf] %v1447_v37  ;;  %v1637_v58 = vld [vmem:[%s2127_s2 + $0x180] sm:$0xff]   ;;  %v1639_v1 = vld [vmem:[%s2127_s2 + $0x108] sm:$0xff]   ;;  %vm2009_vm8 = vmor %vm206_vm5, %vm207_vm6 }
  0x1e   :  { %1459 = vmatprep.subr.bf16.mxu0 %v1611_v17  ;;  %47 = vst [vmem:[#allocation2 + $0x8] sm:$0xf] %v1448_v38  ;;  %v1449_v63 = vpack.c.bf16 %v262_v43, %v262_v43  ;;  %v1450_v0 = vpack.c.bf16 %v263_v46, %v263_v46  ;;  %v1640_v2 = vld [vmem:[%s2127_s2 + $0x1c8] sm:$0xff]   ;;  %v1644_v17 = vld [vmem:[%s2127_s2 + $0x1d0] sm:$0xff]   ;;  %vm2038_vm10 = vmor %vm234_vm7, %vm235_vm9 }
  0x1f   :  { %1486 = vmatpush3.bf16.msra.mxu1 %v1610_v16  ;;  %v1641_v15 = vld [vmem:[%s2127_s2 + $0x188] sm:$0xff]   ;;  %v1643_v16 = vld [vmem:[%s2127_s2 + $0x110] sm:$0xff]  }
  0x20   :  { %1487 = vmatprep.subr.bf16.mxu1 %v1613_v19  ;;  %v1645_v19 = vld [vmem:[%s2127_s2 + $0x190] sm:$0xff]   ;;  %v1657_v33 = vld [vmem:[%s2127_s2 + $0x128] sm:$0xff]  }
  0x21   :  { %1460 = vmatpush3.bf16.msra.mxu0 %v1612_v18  ;;  %v1646_v18 = vld [vmem:[%s2127_s2 + $0x158] sm:$0xff]   ;;  %v1659_v37 = vld [vmem:[%s2127_s2 + $0x1e8] sm:$0xff]   ;;  %v1666_v46 = vld [vmem:[%s2127_s2 + $0x130] sm:$0xff]  }
  0x22   :  { %1461 = vmatprep.subr.bf16.mxu0 %v1615_v21  ;;  %v1648_v21 = vld [vmem:[%s2127_s2 + $0x1d8] sm:$0xff]   ;;  %v1662_v42 = vld [vmem:[%s2127_s2 + $0x1a8] sm:$0xff]  }
  0x23   :  { %1488 = vmatpush3.bf16.msra.mxu1 %v1614_v20  ;;  %v1647_v20 = vld [vmem:[%s2127_s2 + $0x118] sm:$0xff]  }
  0x24   :  { %1489 = vmatprep.subr.bf16.mxu1 %v1617_v23  ;;  %v1626_v44 = vld [vmem:[#allocation2] sm:$0xfe]  }
  0x25   :  { %1462 = vmatpush3.bf16.msra.mxu0 %v1616_v22  ;;  %v1627_v45 = vld [vmem:[#allocation2 + $0x8] ss:$0 sps:$4 sm:$0x11]   ;;  %v69_v47 = vrot.slane %v1626_v44, 1  ;;  %v1629_v48 = vld [vmem:[#allocation2] sm:$0xff]   ;;  %v1665_v44 = vld [vmem:[%s2127_s2 + $0x170] sm:$0xff]  }
  0x26   :  { %1463 = vmatprep.subr.bf16.mxu0 %v1619_v25  ;;  %v70_v50 = vrot.slane %v1627_v45, 1  ;;  %v1631_v51 = vld [vmem:[#allocation2] sm:$0xf8]   ;;  %v1632_v52 = vld [vmem:[#allocation2 + $0x8] ss:$0 sps:$4 sm:$0x77]  }
  0x27   :  { %1490 = vmatpush3.bf16.msra.mxu1 %v1618_v24  ;;  %v1634_v53 = vld [vmem:[#allocation2] sm:$0xfc]   ;;  %v103_v55 = vrot.slane %v1631_v51, 3  ;;  %v104_v56 = vrot.slane %v1632_v52, 3  ;;  %v1863_v62 = vld [vmem:[#allocation2 + $0x8] sm:$0xf] }
  0x28   :  { %1491 = vmatprep.subr.bf16.mxu1 %v1621_v27  ;;  %v71_v54 = vsel %vm68_vm0, %v69_v47, %v70_v50  ;;  %v1635_v57 = vld [vmem:[#allocation2 + $0x8] ss:$0 sps:$4 sm:$0x33]   ;;  %v86_v60 = vrot.slane %v1634_v53, 2  ;;  %v1861_v61 = vld [vmem:[#allocation2 + $0x4] sm:$0xf]  ;;  %v1348_v22 = vcombine.low %v1863_v62, %v1863_v62 }
  0x29   :  { %1464 = vmatpush3.bf16.msra.mxu0 %v1620_v26  ;;  %1107 = vmatprep.mubr.bf16.mxu0 %v71_v54  ;;  %v105_v3 = vsel %vm102_vm1, %v103_v55, %v104_v56  ;;  %v87_v4 = vrot.slane %v1635_v57, 2  ;;  %v1872_v5 = vld [vmem:[#allocation2 + $0x4] sm:$0xf]  ;;  %v1874_v6 = vld [vmem:[#allocation2 + $0x8] sm:$0xf]  ;;  %v1649_v24 = vld [vmem:[%s2127_s2 + $0x198] sm:$0xff]  }
  0x2a   :  { %1465 = vmatprep.subr.bf16.mxu0 %v1623_v29  ;;  %1156 = vmatprep.mubr.bf16.mxu1 %v105_v3  ;;  %v1879_v8 = vld [vmem:[#allocation2 + $0x4] sm:$0xf]  ;;  %v1881_v9 = vld [vmem:[#allocation2 + $0x8] sm:$0xf]  ;;  %v129_v27 = vshrl.u32 %v1348_v22, 16  ;;  %v1349_v38 = vcombine.low %v1872_v5, %v1874_v6  ;;  %v1668_v55 = vld [vmem:[%s2127_s2 + $0x1b0] sm:$0xff]  }
  0x2b   :  { %1492 = vmatpush3.bf16.msra.mxu1 %v1622_v28  ;;  %v1883_v10 = vld [vmem:[#allocation2 + $0x4] sm:$0xe]  ;;  %v88_v11 = vsel %vm85_vm2, %v86_v60, %v87_v4  ;;  %v1886_v12 = vld [vmem:[#allocation2 + $0x8] sm:$0xf]  ;;  %v1350_v50 = vcombine.low %v1879_v8, %v1881_v9  ;;  %v1669_v57 = vld [vmem:[%s2127_s2 + $0x178] sm:$0xff]  }
  0x2c   :  { %1493 = vmatprep.subr.bf16.mxu1 %v1625_v31  ;;  %v1888_v13 = vld [vmem:[#allocation2 + $0x4] sm:$0xc]  ;;  %v1890_v14 = vld [vmem:[#allocation2 + $0x8] sm:$0xf]  ;;  %v1975_v3 = vld [vmem:[#allocation2] sm:$0x8] }
  0x2d   :  { %1466 = vmatpush3.bf16.msra.mxu0 %v1624_v30  ;;  %272 = vst [vmem:[#allocation2 + $0x4] sm:$0xf] %v1449_v63  ;;  %273 = vst [vmem:[#allocation2 + $0x8] sm:$0xf] %v1450_v0  ;;  %v1650_v23 = vld [vmem:[%s2127_s2 + $0x160] sm:$0xff]   ;;  %v1654_v29 = vld [vmem:[%s2127_s2 + $0x168] sm:$0xff]   ;;  %v1352_v63 = vcombine.low %v1883_v10, %v1886_v12 }
  0x2e   :  { %1507 = vmatprep.subr.bf16.mxu0 %v1630_v39  ;;  %v1651_v25 = vld [vmem:[%s2127_s2 + $0x120] sm:$0xff]   ;;  %v132_v30 = vshll.u32 %v1348_v22, 16  ;;  %v163_v56 = vshll.u32 %v1350_v50, 16  ;;  %v1671_v0 = vld [vmem:[%s2127_s2 + $0x1f8] sm:$0xff]  }
  0x2f   :  { %1494 = vmatpush3.bf16.msra.mxu1 %v1628_v36  ;;  %v1652_v26 = vld [vmem:[%s2127_s2 + $0x1e0] sm:$0xff]   ;;  %v185_v12 = vrot.slane %v1352_v63, 1 }
  0x30   :  { %1535 = vmatprep.subr.bf16.mxu1 %v1636_v40  ;;  %1108 = vmatmul.mubr.bf16.vlgmr.msra.gmra.mrb[0].mxu0 %v1629_v48  ;;  %v1653_v28 = vld [vmem:[%s2127_s2 + $0x1a0] sm:$0xff]   ;;  %v134_v60 = vrot.slane %v132_v30, 4  ;;  %v165_v4 = vrot.slane %v163_v56, 1  ;;  %v1676_v30 = vld [vmem:[%s2127_s2 + $0x208] sm:$0xff]  }
  0x31   :  { %1508 = vmatpush3.bf16.msra.mxu0 %v1633_v49  ;;  %v1667_v49 = vld [vmem:[%s2127_s2 + $0x1f0] sm:$0xff]   ;;  %v1673_v10 = vld [vmem:[%s2127_s2 + $0x200] sm:$0xff]  }
  0x32   :  { %1509 = vmatprep.subr.bf16.mxu0 %v1638_v59  ;;  %1157 = vmatmul.mubr.bf16.vlgmr.msra.gmra.mrb[0].mxu1 %v88_v11  ;;  %v1670_v59 = vld [vmem:[%s2127_s2 + $0x138] sm:$0xff]   ;;  %v1674_v11 = vld [vmem:[#allocation2 + $0xc] ss:$0 sps:$4 sm:$0x11]  }
  0x33   :  { %1536 = vmatpush3.bf16.msra.mxu1 %v1637_v58  ;;  %v131_v58 = vrot.slane %v129_v27, 3 }
  0x34   :  { %1537 = vmatprep.subr.bf16.mxu1 %v1640_v2  ;;  %v1655_v31 = vld [vmem:[#allocation2] sm:$0xfe]   ;;  %v1656_v32 = vld [vmem:[#allocation2 + $0x8] ss:$0 sps:$4 sm:$0x11]   ;;  %v1672_v2 = vld [vmem:[%s2127_s2 + $0x1b8] sm:$0xff]  }
  0x35   :  { %1510 = vmatpush3.bf16.msra.mxu0 %v1639_v1  ;;  %v294_v34 = vrot.slane %v1655_v31, 1  ;;  %v295_v35 = vrot.slane %v1656_v32, 1  ;;  %v1658_v36 = vld [vmem:[#allocation2] sm:$0xff]   ;;  %v1661_v41 = vld [vmem:[#allocation2 + $0x8] ss:$0 sps:$4 sm:$0x77]  }
  0x36   :  { %1511 = vmatprep.subr.bf16.mxu0 %v1642_v7  ;;  %v1660_v40 = vld [vmem:[#allocation2] sm:$0xf8]   ;;  %v327_v45 = vrot.slane %v1661_v41, 3  ;;  %v1664_v48 = vld [vmem:[#allocation2 + $0x8] ss:$0 sps:$4 sm:$0x33]   ;;  %v1347_v7 = vcombine.low %v1975_v3, %v1861_v61 }
  0x37   :  { %1538 = vmatpush3.bf16.msra.mxu1 %v1641_v15  ;;  %v296_v39 = vsel %vm68_vm0, %v294_v34, %v295_v35  ;;  %v326_v43 = vrot.slane %v1660_v40, 3  ;;  %v1663_v47 = vld [vmem:[#allocation2] sm:$0xfc]   ;;  %v311_v53 = vrot.slane %v1664_v48, 2  ;;  %v161_v1 = vshrl.u32 %v1350_v50, 16 }
  0x38   :  { %1539 = vmatprep.subr.bf16.mxu1 %v1644_v17  ;;  %1115 = vmatprep.mubr.bf16.mxu0 %v296_v39  ;;  %v310_v52 = vrot.slane %v1663_v47, 2  ;;  %v1982_v15 = vld [vmem:[#allocation2 + $0xc] sm:$0x1]  ;;  %v124_v17 = vshll.u32 %v1347_v7, 16  ;;  %v361_v27 = vld [vmem:[#allocation2 + $0x4] sm:$0xf] }
  0x39   :  { %1512 = vmatpush3.bf16.msra.mxu0 %v1643_v16  ;;  %v328_v51 = vsel %vm102_vm1, %v326_v43, %v327_v45  ;;  %v121_v16 = vshrl.u32 %v1347_v7, 16  ;;  %v362_v31 = vld [vmem:[#allocation2 + $0x8] sm:$0xf]  ;;  %v428_v32 = vshll.u32 %v361_v27, 16  ;;  %v1680_v47 = vld [vmem:[%s2127_s2 + $0x210] sm:$0xff]  }
  0x3a   :  { %1513 = vmatprep.subr.bf16.mxu0 %v1646_v18  ;;  %1116 = vmatmul.mubr.bf16.gmra.mrb[4].mxu0 %v1658_v36  ;;  %v312_v54 = vsel %vm85_vm2, %v310_v52, %v311_v53  ;;  %v1351_v18 = vcombine.low %v1982_v15, %v1982_v15  ;;  %v1367_v34 = vcombine.low %v361_v27, %v362_v31  ;;  %v437_v35 = vshll.u32 %v362_v31, 16  ;;  %v1681_v50 = vld [vmem:[#allocation2 + $0x4] sm:$0xfe]   ;;  %v372_v7 = vld [vmem:[#allocation2 + $0xc] sm:$0x1] }
  0x3b   :  { %1540 = vmatpush3.bf16.msra.mxu1 %v1645_v19  ;;  %1205 = vmatprep.mubr.bf16.mxu0 %v1349_v38  ;;  %v135_v19 = vor.u32 %v134_v60, %v131_v58  ;;  %v123_v22 = vrot.slane %v121_v16, 3  ;;  %v441_v36 = vshrl.u32 %v362_v31, 16  ;;  %v1992_v38 = vld [vmem:[#allocation2 + $0x8] sm:$0xf]  ;;  %v430_v41 = vrot.slane %v428_v32, 5 }
  0x3c   :  { %1541 = vmatprep.subr.bf16.mxu1 %v1648_v21  ;;  %1164 = vmatprep.mubr.bf16.mxu1 %v328_v51  ;;  %v166_v21 = vor.u32 %v165_v4, %v161_v1  ;;  %v439_v43 = vrot.slane %v437_v35, 5  ;;  %v2003_v51 = vld [vmem:[#allocation2 + $0x4] sm:$0xf]  ;;  %v1354_v52 = vcombine.low %v1888_v13, %v1890_v14  ;;  %v1682_v58 = vld [vmem:[#allocation2 + $0xc] ss:$0 sps:$4 sm:$0x11]  }
  0x3d   :  { %1514 = vmatpush3.bf16.msra.mxu0 %v1647_v20  ;;  %1165 = vmatmul.mubr.bf16.gmra.mrb[4].mxu1 %v312_v54  ;;  %v186_v20 = vrot.slane %v1674_v11, 1  ;;  %v406_v63 = vrot.slane %v1681_v50, 1  ;;  %v452_v1 = vrot.slane %v2003_v51, 5  ;;  %v407_v16 = vrot.slane %v1682_v58, 1 }
  0x3e   :  { %1515 = vmatprep.subr.bf16.mxu0 %v1650_v23  ;;  %v126_v23 = vrot.slane %v124_v17, 4 }
  0x3f   :  { %1542 = vmatpush3.bf16.msra.mxu1 %v1649_v24  ;;  %v168_v24 = vshll.u32 %v1351_v18, 16 }
  0x40   :  { %1543 = vmatprep.subr.bf16.mxu1 %v1652_v26  ;;  %v1987_v26 = vld [vmem:[#allocation2] sm:$0x8] }
  0x41   :  { %1516 = vmatpush3.bf16.msra.mxu0 %v1651_v25  ;;  %v187_v25 = vsel %vm68_vm0, %v185_v12, %v186_v20 }
  0x42   :  { %1517 = vmatprep.subr.bf16.mxu0 %v1654_v29  ;;  %1254 = vmatprep.mubr.bf16.mxu1 %v187_v25  ;;  %v170_v29 = vrot.slane %v168_v24, 1 }
  0x43   :  { %1544 = vmatpush3.bf16.msra.mxu1 %v1653_v28  ;;  %v127_v28 = vor.u32 %v126_v23, %v123_v22  ;;  %v408_v23 = vsel %vm68_vm0, %v406_v63, %v407_v16  ;;  %v223_v63 = vshrl.u32 %v1874_v6, 16 }
  0x44   :  { %1545 = vmatprep.subr.bf16.mxu1 %v1659_v37  ;;  %v332_v37 = vld [vmem:[#allocation2 + $0x4] sm:$0xf]  ;;  %v171_v40 = vsel %vm159_vm4, %v166_v21, %v170_v29  ;;  %v1369_v21 = vcombine.low %v372_v7, %v372_v7 }
  0x45   :  { %1518 = vmatpush3.bf16.msra.mxu0 %v1657_v33  ;;  %v431_v33 = vshrl.u32 %v361_v27, 16  ;;  %v136_v39 = vsel %vm119_vm3, %v127_v28, %v135_v19  ;;  %v1365_v45 = vcombine.low %v1987_v26, %v332_v37  ;;  %v457_v28 = vrot.slane %v372_v7, 5 }
  0x46   :  { %1519 = vmatprep.subr.bf16.mxu0 %v1665_v44  ;;  %v443_v44 = vrot.slane %v441_v36, 4 }
  0x47   :  { %1546 = vmatpush3.bf16.msra.mxu1 %v1662_v42  ;;  %v433_v42 = vrot.slane %v431_v33, 4  ;;  %v346_v56 = vshll.u32 %v1365_v45, 16 }
  0x48   :  { %1547 = vmatprep.subr.bf16.mxu1 %v1667_v49  ;;  %v449_v49 = vmax.bf16 %v430_v41, %v1987_v26  ;;  %v444_v54 = vor.u32 %v443_v44, %v439_v43  ;;  %v389_v26 = vshll.u32 %v1369_v21, 16 }
  0x49   :  { %1520 = vmatpush3.bf16.msra.mxu0 %v1666_v46  ;;  %v1366_v46 = vcombine.low %v1992_v38, %v1992_v38  ;;  %v434_v48 = vor.u32 %v433_v42, %v430_v41 }
  0x4a   :  { %1521 = vmatprep.subr.bf16.mxu0 %v1669_v57  ;;  %v2016_v13 = vrot.slane %v444_v54, 4  ;;  %v462_v31 = vmax.bf16 %v452_v1, %v449_v49  ;;  %v391_v32 = vrot.slane %v389_v26, 1  ;;  %v453_v54 = vrot.slane %v452_v1, 4 }
  0x4b   :  { %1548 = vmatpush3.bf16.msra.mxu1 %v1668_v55  ;;  %v343_v55 = vshrl.u32 %v1365_v45, 16  ;;  %v351_v57 = vshrl.u32 %v1366_v46, 16  ;;  %v354_v60 = vshll.u32 %v1366_v46, 16  ;;  %v1688_v45 = vld [vmem:[%s2127_s2 + $0x230] sm:$0xff]   ;;  %v1691_v46 = vld [vmem:[#allocation2 + $0x4] sm:$0xfc]  }
  0x4c   :  { %1549 = vmatprep.subr.bf16.mxu1 %v1671_v0  ;;  %v2013_v0 = vld [vmem:[#allocation2 + $0x8] sm:$0xf]  ;;  %v451_v20 = vmax.bf16 %v2016_v13, %v1992_v38  ;;  %v422_v49 = vrot.slane %v1691_v46, 2  ;;  %v465_v1 = vunpack.c.l.bf16 %v462_v31 }
  0x4d   :  { %1522 = vmatpush3.bf16.msra.mxu0 %v1670_v59  ;;  %v435_v59 = vrot.slane %v434_v48, 4  ;;  %v345_v14 = vrot.slane %v343_v55, 3  ;;  %v353_v4 = vrot.slane %v351_v57, 3  ;;  %v356_v12 = vrot.slane %v354_v60, 4  ;;  %v1689_v48 = vld [vmem:[%s2127_s2 + $0x238] sm:$0xff]  }
  0x4e   :  { %1573 = vmatprep.subr.bf16.mxu0 %v1673_v10  ;;  %v1368_v17 = vcombine.low %v2003_v51, %v2013_v0  ;;  %v454_v27 = vrot.slane %v2013_v0, 5  ;;  %v210_v55 = vshll.u32 %v1872_v5, 16  ;;  %v219_v60 = vshll.u32 %v1874_v6, 16 }
  0x4f   :  { %1550 = vmatpush3.bf16.msra.mxu1 %v1672_v2  ;;  %v348_v2 = vrot.slane %v346_v56, 4  ;;  %v440_v11 = vsel %vm2009_vm8, %v435_v59, %v439_v43  ;;  %v357_v22 = vor.u32 %v356_v12, %v353_v4  ;;  %v1687_v43 = vld [vmem:[%s2127_s2 + $0x228] sm:$0xff]   ;;  %v213_v56 = vshrl.u32 %v1872_v5, 16 }
  0x50   :  { %1206 = vmatmul.mubr.bf16.vlgmr.msra.gmra.mrb[8].mxu0 %v136_v39  ;;  %v2025_v19 = vmax.bf16 %v440_v11, %v332_v37  ;;  %v382_v24 = vshrl.u32 %v1368_v17, 16  ;;  %v384_v25 = vshll.u32 %v1368_v17, 16  ;;  %v456_v33 = vrot.slane %v454_v27, 4  ;;  %v1690_v37 = vld [vmem:[#allocation2 + $0xc] ss:$0 sps:$4 sm:$0x33]  }
  0x51   :  { %1574 = vmatpush3.bf16.msra.mxu0 %v1673_v10  ;;  %1213 = vmatprep.mubr.bf16.mxu0 %v1367_v34  ;;  %v1685_v10 = vld [vmem:[%s2127_s2 + $0x218] sm:$0xff]   ;;  %v349_v18 = vor.u32 %v348_v2, %v345_v14  ;;  %v1686_v34 = vld [vmem:[%s2127_s2 + $0x220] sm:$0xff]   ;;  %v201_v39 = vrot.slane %v1354_v52, 2  ;;  %v202_v42 = vrot.slane %v1690_v37, 2  ;;  %v212_v57 = vrot.slane %v210_v55, 5 }
  0x52   :  { %1255 = vmatmul.mubr.bf16.vlgmr.msra.gmra.mrb[8].mxu1 %v171_v40  ;;  %1575 = vmatprep.subr.bf16.mxu0 %v1676_v30  ;;  %v458_v40 = vsel %vm2038_vm10, %v456_v33, %v457_v28  ;;  %v215_v58 = vrot.slane %v213_v56, 4  ;;  %v455_v59 = vsel %vm2038_vm10, %v453_v54, %v454_v27  ;;  %v221_v2 = vrot.slane %v219_v60, 5 }
  0x53   :  { %1262 = vmatprep.mubr.bf16.mxu1 %v408_v23  ;;  %v358_v29 = vsel %vm119_vm3, %v349_v18, %v357_v22  ;;  %v203_v44 = vsel %vm85_vm2, %v201_v39, %v202_v42  ;;  %v463_v0 = vmax.bf16 %v455_v59, %v2025_v19  ;;  %v225_v51 = vrot.slane %v223_v63, 4 }
  0x54   :  { %v216_v14 = vor.u32 %v215_v58, %v212_v57  ;;  %v237_v5 = vrot.slane %v1879_v8, 5  ;;  %v242_v11 = vrot.slane %v1982_v15, 5  ;;  %v239_v17 = vrot.slane %v1881_v9, 5 }
  0x55   :  { %1576 = vmatpush3.bf16.msra.mxu0 %v1676_v30  ;;  %v386_v30 = vrot.slane %v384_v25, 1  ;;  %v466_v4 = vunpack.c.l.bf16 %v463_v0  ;;  %v253_v6 = vstv %s1337_s7  ;;  %v231_v18 = vmax.bf16 %v212_v57, %v1975_v3 }
  0x56   :  { %1577 = vmatprep.subr.bf16.mxu0 %v1680_v47  ;;  %v217_v7 = vrot.slane %v216_v14, 4  ;;  %v238_v16 = vrot.slane %v237_v5, 4  ;;  %v468_v22 = vmul.f32 %v465_v1, %v253_v6 }
  0x57   :  { %v387_v36 = vor.u32 %v386_v30, %v382_v24  ;;  %v469_v23 = vmul.f32 %v466_v4, %v253_v6  ;;  %v241_v24 = vrot.slane %v239_v17, 4  ;;  %v247_v25 = vmax.bf16 %v237_v5, %v231_v18 }
  0x58   :  { %1214 = vmatmul.mubr.bf16.gmra.mrb[12].mxu0 %v358_v29  ;;  %v222_v12 = vsel %vm2009_vm8, %v217_v7, %v221_v2  ;;  %v240_v8 = vsel %vm2038_vm10, %v238_v16, %v239_v17  ;;  %471 = vst [vmem:[%s2129_s4 + $0x9] sm:$0x80] %v468_v22 }
  0x59   :  { %1578 = vmatpush3.bf16.msra.mxu0 %v1680_v47  ;;  %v392_v41 = vsel %vm159_vm4, %v387_v36, %v391_v32  ;;  %1589 = vmatprep.mubr.bf16.mxu0 %v203_v44  ;;  %v1692_v47 = vld [vmem:[#allocation2 + $0xc] ss:$0 sps:$4 sm:$0x33]   ;;  %v232_v19 = vmax.bf16 %v222_v12, %v1861_v61  ;;  %472 = vst [vmem:[%s2129_s4 + $0x11] sm:$0xff] %v469_v23  ;;  %v250_v3 = vunpack.c.l.bf16 %v247_v25 }
  0x5a   :  { %1579 = vmatprep.subr.bf16.mxu0 %v1685_v10  ;;  %1263 = vmatmul.mubr.bf16.gmra.mrb[12].mxu1 %v392_v41  ;;  %v423_v50 = vrot.slane %v1692_v47, 2  ;;  %v464_v61 = vmax.bf16 %v458_v40, %v451_v20  ;;  %v243_v9 = vsel %vm2038_vm10, %v241_v24, %v242_v11  ;;  %v1374_v20 = vld [vmem:[%s2128_s3] ss:$0 sm:$0xff] }
  0x5b   :  { %v248_v15 = vmax.bf16 %v240_v8, %v232_v19 }
  0x5c   :  { %v424_v52 = vsel %vm85_vm2, %v422_v49, %v423_v50  ;;  %v467_v28 = vunpack.c.l.bf16 %v464_v61 }
  0x5d   :  { %1580 = vmatpush3.bf16.msra.mxu0 %v1685_v10  ;;  %v226_v10 = vor.u32 %v225_v51, %v221_v2  ;;  %v251_v26 = vunpack.c.l.bf16 %v248_v15 }
  0x5e   :  { %1581 = vmatprep.subr.bf16.mxu0 %v1686_v34  ;;  %v470_v31 = vmul.f32 %v467_v28, %v253_v6 }
  0x5f   :  { %v227_v21 = vrot.slane %v226_v10, 4  ;;  %v255_v29 = vmul.f32 %v253_v6, %v251_v26 }
  0x60   :  { %473 = vst [vmem:[%s2129_s4 + $0x19] sm:$0x7f] %v470_v31 }
  0x61   :  { %1582 = vmatpush3.bf16.msra.mxu0 %v1686_v34  ;;  %v233_v53 = vmax.bf16 %v227_v21, %v1863_v62  ;;  %v254_v62 = vmul.f32 %v253_v6, %v250_v3  ;;  %258 = vst [vmem:[%s2129_s4 + $0x1] sm:$0xff] %v255_v29 }
  0x62   :  { %1583 = vmatprep.subr.bf16.mxu0 %v1687_v43 }
  0x63   :  { %v249_v27 = vmax.bf16 %v243_v9, %v233_v53  ;;  %257 = vst [vmem:[%s2129_s4 - $0x7] sm:$0x80] %v254_v62 }
  0x65   :  { %1584 = vmatpush3.bf16.msra.mxu0 %v1687_v43  ;;  %v252_v30 = vunpack.c.l.bf16 %v249_v27 }
  0x66   :  { %1585 = vmatprep.subr.bf16.mxu0 %v1688_v45 }
  0x67   :  { %v256_v38 = vmul.f32 %v253_v6, %v252_v30 }
  0x69   :  { %1586 = vmatpush3.bf16.msra.mxu0 %v1688_v45  ;;  %259 = vst [vmem:[%s2129_s4 + $0x9] sm:$0x7f] %v256_v38 }
  0x6a   :  { %1587 = vmatprep.subr.bf16.mxu0 %v1689_v48 }
  0x6d   :  { %1588 = vmatpush3.bf16.msra.mxu0 %v1689_v48 }
  0x70   :  { %1590 = vmatmul.mubr.bf16.vlgmr.msra.gmra.mrb[16].mxu0 %v424_v52 }
 0x103   :  { %v1467_v13 = vpop.f32.mrb[0].mxu0 }
 0x104   :  { %v1468_v32 = vpop.f32.mrb[1].mxu0 }
 0x105   :  { %v1469_v33 = vadd.f32 %v1468_v32, %v1467_v13  ;;  %v1470_v34 = vpop.f32.mrb[2].mxu0  ;;  %v1495_v35 = vpop.f32.mrb[0].mxu1  ;;  %v1322_v32 = vld [vmem:[%s2129_s4 + $0x10] sm:$0xff] }
 0x106   :  { %v1471_v36 = vpop.f32.mrb[3].mxu0  ;;  %v1496_v40 = vpop.f32.mrb[1].mxu1 }
 0x107   :  { %v1110_v37 = vadd.f32 %v1469_v33, %v1374_v20  ;;  %v1472_v39 = vadd.f32 %v1471_v36, %v1470_v34  ;;  %v1497_v41 = vadd.f32 %v1496_v40, %v1495_v35  ;;  %v1498_v42 = vpop.f32.mrb[2].mxu1  ;;  %v1320_v35 = vld [vmem:[%s2129_s4] sm:$0xff] }
 0x108   :  { %v1499_v44 = vpop.f32.mrb[3].mxu1 }
 0x109   :  { %v1113_v43 = vadd.f32 %v1472_v39, %v1374_v20  ;;  %v1159_v45 = vadd.f32 %v1497_v41, %v1110_v37  ;;  %v1500_v46 = vadd.f32 %v1499_v44, %v1498_v42  ;;  %v1323_v39 = vld [vmem:[%s2129_s4 + $0x18] sm:$0xff] }
 0x10b   :  { %v1162_v47 = vadd.f32 %v1500_v46, %v1113_v43  ;;  %v1321_v43 = vld [vmem:[%s2129_s4 + $0x8] sm:$0xff] }
 0x10d   :  { %v1473_v48 = vpop.f32.mrb[4].mxu0 }
 0x10e   :  { %v1474_v49 = vpop.f32.mrb[5].mxu0 }
 0x10f   :  { %v1475_v50 = vadd.f32 %v1474_v49, %v1473_v48  ;;  %v1476_v52 = vpop.f32.mrb[6].mxu0 }
 0x110   :  { %v1477_v54 = vpop.f32.mrb[7].mxu0  ;;  %v1501_v57 = vpop.f32.mrb[4].mxu1 }
 0x111   :  { %v1478_v55 = vadd.f32 %v1477_v54, %v1476_v52  ;;  %v1118_v56 = vadd.f32 %v1475_v50, %v1374_v20  ;;  %v1502_v58 = vpop.f32.mrb[5].mxu1 }
 0x112   :  { %v1503_v60 = vadd.f32 %v1502_v58, %v1501_v57  ;;  %v1504_v63 = vpop.f32.mrb[6].mxu1 }
 0x113   :  { %v1121_v59 = vadd.f32 %v1478_v55, %v1374_v20  ;;  %v1505_v0 = vpop.f32.mrb[7].mxu1 }
 0x114   :  { %v1167_v14 = vadd.f32 %v1503_v60, %v1118_v56  ;;  %v1506_v2 = vadd.f32 %v1505_v0, %v1504_v63 }
 0x116   :  { %v1170_v51 = vadd.f32 %v1506_v2, %v1121_v59 }
 0x123   :  { %v1523_v1 = vpop.f32.mrb[8].mxu0 }
 0x124   :  { %v1524_v7 = vpop.f32.mrb[9].mxu0 }
 0x125   :  { %v1551_v4 = vpop.f32.mrb[8].mxu1  ;;  %v1525_v10 = vadd.f32 %v1524_v7, %v1523_v1  ;;  %v1526_v11 = vpop.f32.mrb[10].mxu0 }
 0x126   :  { %v1552_v5 = vpop.f32.mrb[9].mxu1  ;;  %v1527_v17 = vpop.f32.mrb[11].mxu0 }
 0x127   :  { %v1553_v12 = vadd.f32 %v1552_v5, %v1551_v4  ;;  %v1554_v16 = vpop.f32.mrb[10].mxu1  ;;  %v1208_v18 = vadd.f32 %v1525_v10, %v1159_v45  ;;  %v1528_v19 = vadd.f32 %v1527_v17, %v1526_v11 }
 0x128   :  { %v1555_v6 = vpop.f32.mrb[11].mxu1 }
 0x129   :  { %v1556_v21 = vadd.f32 %v1555_v6, %v1554_v16  ;;  %v1211_v22 = vadd.f32 %v1528_v19, %v1162_v47  ;;  %v1257_v23 = vadd.f32 %v1553_v12, %v1208_v18 }
 0x12b   :  { %v1260_v8 = vadd.f32 %v1556_v21, %v1211_v22  ;;  %v1529_v24 = vpop.f32.mrb[12].mxu0 }
 0x12c   :  { %v1530_v25 = vpop.f32.mrb[13].mxu0 }
 0x12d   :  { %v1531_v15 = vadd.f32 %v1530_v25, %v1529_v24  ;;  %v1532_v53 = vpop.f32.mrb[14].mxu0  ;;  %v1557_v3 = vpop.f32.mrb[12].mxu1 }
 0x12e   :  { %v1533_v61 = vpop.f32.mrb[15].mxu0  ;;  %v1558_v27 = vpop.f32.mrb[13].mxu1 }
 0x12f   :  { %v1216_v9 = vadd.f32 %v1531_v15, %v1167_v14  ;;  %v1534_v26 = vadd.f32 %v1533_v61, %v1532_v53  ;;  %v1559_v62 = vadd.f32 %v1558_v27, %v1557_v3  ;;  %v1560_v29 = vpop.f32.mrb[14].mxu1 }
 0x130   :  { %v1561_v30 = vpop.f32.mrb[15].mxu1 }
 0x131   :  { %v1219_v28 = vadd.f32 %v1534_v26, %v1170_v51  ;;  %v1562_v31 = vadd.f32 %v1561_v30, %v1560_v29  ;;  %v1265_v38 = vadd.f32 %v1559_v62, %v1216_v9 }
 0x133   :  { %v1268_v13 = vadd.f32 %v1562_v31, %v1219_v28 }
 0x143   :  { %v1591_v20 = vpop.f32.mrb[16].mxu0 }
 0x144   :  { %v1314_v33 = vadd.f32 %v1591_v20, %v1265_v38  ;;  %v1305_v34 = vpop.f32.mrb[17].mxu0 }
 0x145   :  { %v1306_v36 = vadd.f32 %v1305_v34, %v1257_v23  ;;  %v1592_v37 = vpop.f32.mrb[18].mxu0 }
 0x146   :  { %v1326_v40 = vadd.f32 %v1322_v32, %v1314_v33  ;;  %v1317_v41 = vadd.f32 %v1592_v37, %v1268_v13  ;;  %v1308_v42 = vpop.f32.mrb[19].mxu0 }
 0x147   :  { %v1324_v44 = vadd.f32 %v1320_v35, %v1306_v36  ;;  %v1309_v45 = vadd.f32 %v1308_v42, %v1260_v8 }
 0x148   :  { %1330 = vst [vmem:[%s2129_s4 + $0x10] sm:$0xff] %v1326_v40  ;;  %v1327_v46 = vadd.f32 %v1323_v39, %v1317_v41 }
 0x149   :  { %1328 = vst [vmem:[%s2129_s4] sm:$0xff] %v1324_v44  ;;  %v1325_v47 = vadd.f32 %v1321_v43, %v1309_v45 }
 0x14a   :  { %1331 = vst [vmem:[%s2129_s4 + $0x18] sm:$0xff] %v1327_v46 }
 0x14b   :  { %1329 = vst [vmem:[%s2129_s4 + $0x8] sm:$0xff] %v1325_v47 }
 0x14c   :  { %1336 = vsyncpa [#allocation5], 1 }

</bundles_post_ra>
